<compile_context>
chip_gen: v7x
topology: tpu7x:2x2x1
jax: 0.10.0
libtpu: 0.0.40
codegen_flags: <defaults>
</compile_context>

<pallas_src>
import functools

import jax
import jax.numpy as jnp
import numpy as np
from jax import lax
from jax.experimental import pallas as pl
from jax.experimental.pallas import tpu as pltpu


def _mmd_kernel(src_ref, tgt_ref, out_ref, *, batch_size, kernel_mul, kernel_num):
    # src_ref, tgt_ref: (B, D) float32 in VMEM; out_ref: (6,) float32 in SMEM.
    s = src_ref[...].astype(jnp.float32)          # (B, D)
    t = tgt_ref[...].astype(jnp.float32)          # (B, D)
    B = batch_size
    D = s.shape[1]
    n = 2 * B

    # dot(a, b) contracts the last (feature/lane) axis of both: a @ b^T on MXU.
    dot = functools.partial(
        lax.dot_general,
        dimension_numbers=(((1,), (1,)), ((), ())),
        preferred_element_type=jnp.float32,
        precision=lax.Precision.HIGHEST,
    )

    ss = s * s
    tt = t * t
    ones_d = jnp.ones((1, D), jnp.float32)

    # Row-wise squared norms in both broadcast layouts, via MXU (no transposes).
    sq_s_col = dot(ss, ones_d)                    # (B, 1)  ||s_i||^2
    sq_t_col = dot(tt, ones_d)                    # (B, 1)  ||t_i||^2
    sq_s_row = dot(ones_d, ss)                    # (1, B)
    sq_t_row = dot(ones_d, tt)                    # (1, B)

    # Gram blocks on the MXU.
    g_ss = dot(s, s)                              # (B, B)
    g_st = dot(s, t)                              # (B, B)
    g_tt = dot(t, t)                              # (B, B)

    # Pairwise squared L2 distances via the Gram identity; clamp tiny negatives
    # from catastrophic cancellation (diagonal especially).
    l2_ss = jnp.maximum(sq_s_col + sq_s_row - 2.0 * g_ss, 0.0)
    l2_st = jnp.maximum(sq_s_col + sq_t_row - 2.0 * g_st, 0.0)
    l2_tt = jnp.maximum(sq_t_col + sq_t_row - 2.0 * g_tt, 0.0)

    # Stack the unique quadrants along sublanes (8-aligned rows) so the
    # bandwidth ladder runs one exp per rung over a single (3B, B) tile.
    l2_all = jnp.concatenate([l2_ss, l2_st, l2_tt], axis=0)   # (3B, B)

    # Full (2B, 2B) statistics. The TS quadrant is ST^T, so its sum equals
    # sum(l2_st) and its max equals max(l2_st) (already inside l2_all).
    l2_sum = jnp.sum(l2_all) + jnp.sum(l2_st)
    l2_max = jnp.max(l2_all)

    # Data-dependent bandwidth (fix_sigma is None in the module).
    n_samples = float(n)
    bandwidth = l2_sum / (n_samples * n_samples - n_samples)
    bandwidth = bandwidth / (kernel_mul ** (kernel_num // 2))

    # Bandwidth ladder: one exact scalar reciprocal per rung, then only an
    # elementwise multiply + exp (+ add) on the stacked tile.
    kern_all = None
    for i in range(kernel_num):
        neg_inv_bw = -1.0 / (bandwidth * (kernel_mul ** i) + 1e-9)
        e = jnp.exp(l2_all * neg_inv_bw)
        kern_all = e if kern_all is None else kern_all + e

    # Sublane-aligned row slices recover the three quadrant means.
    xx = jnp.mean(kern_all[0 * B:1 * B])
    xy = jnp.mean(kern_all[1 * B:2 * B])
    yy = jnp.mean(kern_all[2 * B:3 * B])
    yx = xy  # mean of the transposed YX block == mean of XY block
    # mean(XX + YY - XY - YX) over same-shape blocks == xx + yy - xy - yx.
    loss = xx + yy - xy - yx

    out_ref[0] = loss
    out_ref[1] = l2_max
    out_ref[2] = xx
    out_ref[3] = yy
    out_ref[4] = xy
    out_ref[5] = yx


def mmd_loss(source, target, kernel_mul=2.0, kernel_num=5):
    """Returns (loss, max(L2dist), [xx_mean, yy_mean, xy_mean, yx_mean])."""
    assert source.shape == target.shape and source.ndim == 2
    B = source.shape[0]

    out = pl.pallas_call(
        functools.partial(
            _mmd_kernel,
            batch_size=B,
            kernel_mul=float(kernel_mul),
            kernel_num=int(kernel_num),
        ),
        out_shape=jax.ShapeDtypeStruct((6,), jnp.float32),
        in_specs=[
            pl.BlockSpec(memory_space=pltpu.MemorySpace.VMEM),
            pl.BlockSpec(memory_space=pltpu.MemorySpace.VMEM),
        ],
        out_specs=pl.BlockSpec(memory_space=pltpu.MemorySpace.SMEM),
    )(source.astype(jnp.float32), target.astype(jnp.float32))

    loss = out[0]
    max_l2 = out[1]
    return loss, max_l2, [out[2], out[3], out[4], out[5]]


def _mmd_reference(source, target, kernel_mul=2.0, kernel_num=5):
    """Pure-JAX reference mirroring the PyTorch module, for a sanity check."""
    B = source.shape[0]
    total = jnp.concatenate([source, target], axis=0).astype(jnp.float32)
    n = total.shape[0]
    diff = total[None, :, :] - total[:, None, :]
    l2 = jnp.sum(diff * diff, axis=2)
    bandwidth = jnp.sum(l2) / (n * n - n)
    bandwidth = bandwidth / (kernel_mul ** (kernel_num // 2))
    kern = sum(
        jnp.exp(-l2 / (bandwidth * kernel_mul**i + 1e-9)) for i in range(kernel_num)
    )
    xx = jnp.mean(kern[:B, :B])
    yy = jnp.mean(kern[B:, B:])
    xy = jnp.mean(kern[:B, B:])
    yx = jnp.mean(kern[B:, :B])
    loss = jnp.mean(kern[:B, :B] + kern[B:, B:] - kern[:B, B:] - kern[B:, :B])
    return loss, jnp.max(l2), [xx, yy, xy, yx]


if __name__ == "__main__":
    # MMD_Loss.forward takes flat feature vectors: (batch, hidden).
    key = jax.random.PRNGKey(0)
    k_src, k_tgt = jax.random.split(key)
    source = jax.random.normal(k_src, (8, 32), dtype=jnp.float32)
    target = 0.5 * jax.random.normal(k_tgt, (8, 32), dtype=jnp.float32) + 0.25

    loss, max_l2, stats = mmd_loss(source, target)
    jax.block_until_ready(loss)
    jax.block_until_ready(max_l2)
    jax.block_until_ready(stats)

    # Quiet correctness check against the pure-JAX reference (tolerance covers
    # the Gram-identity reformulation of the distance computation).
    ref_loss, ref_max, ref_stats = _mmd_reference(source, target)
    np.testing.assert_allclose(np.asarray(loss), np.asarray(ref_loss), rtol=1e-3, atol=1e-4)
    np.testing.assert_allclose(np.asarray(max_l2), np.asarray(ref_max), rtol=1e-3, atol=1e-4)
    for got, want in zip(stats, ref_stats):
        np.testing.assert_allclose(np.asarray(got), np.asarray(want), rtol=1e-3, atol=1e-4)

    print("KERNEL_OK")
</pallas_src>

<mosaic_0001>
module attributes {stable_mosaic.version = 11 : i64} {
  func.func @_mmd_kernel(%arg0: memref<8x32xf32, #tpu.memory_space<vmem>>, %arg1: memref<8x32xf32, #tpu.memory_space<vmem>>, %arg2: memref<6xf32, #tpu.memory_space<smem>>) attributes {dimension_semantics = [], scalar_prefetch = 0 : i64, scratch_operands = 0 : i64, tpu.core_type = #tpu.core_type<tc>} {
    %c0 = arith.constant 0 : index
    %c0_0 = arith.constant 0 : index
    %0 = vector.load %arg0[%c0, %c0_0] : memref<8x32xf32, #tpu.memory_space<vmem>>, vector<8x32xf32>
    %c0_1 = arith.constant 0 : index
    %c0_2 = arith.constant 0 : index
    %1 = vector.load %arg1[%c0_1, %c0_2] : memref<8x32xf32, #tpu.memory_space<vmem>>, vector<8x32xf32>
    %2 = arith.mulf %0, %0 : vector<8x32xf32>
    %3 = arith.mulf %1, %1 : vector<8x32xf32>
    %cst = arith.constant 1.000000e+00 : f32
    %4 = vector.broadcast %cst : f32 to vector<1x32xf32>
    %cst_3 = arith.constant dense<0.000000e+00> : vector<8x1xf32>
    %5 = tpu.matmul %2, %4, %cst_3 {dimension_numbers = #tpu.dot_dimension_numbers<[1], [1], [0], [0], [0, 0, 1, 0], [], []>, precision = #tpu.contract_precision<fp32>} : vector<8x32xf32>, vector<1x32xf32>, vector<8x1xf32> -> vector<8x1xf32>
    %cst_4 = arith.constant dense<0.000000e+00> : vector<8x1xf32>
    %6 = tpu.matmul %3, %4, %cst_4 {dimension_numbers = #tpu.dot_dimension_numbers<[1], [1], [0], [0], [0, 0, 1, 0], [], []>, precision = #tpu.contract_precision<fp32>} : vector<8x32xf32>, vector<1x32xf32>, vector<8x1xf32> -> vector<8x1xf32>
    %cst_5 = arith.constant dense<0.000000e+00> : vector<1x8xf32>
    %7 = tpu.matmul %4, %2, %cst_5 {dimension_numbers = #tpu.dot_dimension_numbers<[1], [1], [0], [0], [0, 0, 1, 0], [], []>, precision = #tpu.contract_precision<fp32>} : vector<1x32xf32>, vector<8x32xf32>, vector<1x8xf32> -> vector<1x8xf32>
    %cst_6 = arith.constant dense<0.000000e+00> : vector<1x8xf32>
    %8 = tpu.matmul %4, %3, %cst_6 {dimension_numbers = #tpu.dot_dimension_numbers<[1], [1], [0], [0], [0, 0, 1, 0], [], []>, precision = #tpu.contract_precision<fp32>} : vector<1x32xf32>, vector<8x32xf32>, vector<1x8xf32> -> vector<1x8xf32>
    %cst_7 = arith.constant dense<0.000000e+00> : vector<8x8xf32>
    %9 = tpu.matmul %0, %0, %cst_7 {dimension_numbers = #tpu.dot_dimension_numbers<[1], [1], [0], [0], [0, 0, 1, 0], [], []>, precision = #tpu.contract_precision<fp32>} : vector<8x32xf32>, vector<8x32xf32>, vector<8x8xf32> -> vector<8x8xf32>
    %cst_8 = arith.constant dense<0.000000e+00> : vector<8x8xf32>
    %10 = tpu.matmul %0, %1, %cst_8 {dimension_numbers = #tpu.dot_dimension_numbers<[1], [1], [0], [0], [0, 0, 1, 0], [], []>, precision = #tpu.contract_precision<fp32>} : vector<8x32xf32>, vector<8x32xf32>, vector<8x8xf32> -> vector<8x8xf32>
    %cst_9 = arith.constant dense<0.000000e+00> : vector<8x8xf32>
    %11 = tpu.matmul %1, %1, %cst_9 {dimension_numbers = #tpu.dot_dimension_numbers<[1], [1], [0], [0], [0, 0, 1, 0], [], []>, precision = #tpu.contract_precision<fp32>} : vector<8x32xf32>, vector<8x32xf32>, vector<8x8xf32> -> vector<8x8xf32>
    %12 = vector.broadcast %5 : vector<8x1xf32> to vector<8x8xf32>
    %13 = vector.broadcast %7 : vector<1x8xf32> to vector<8x8xf32>
    %14 = arith.addf %12, %13 : vector<8x8xf32>
    %cst_10 = arith.constant 2.000000e+00 : f32
    %15 = vector.broadcast %cst_10 : f32 to vector<8x8xf32>
    %16 = arith.mulf %15, %9 : vector<8x8xf32>
    %17 = arith.subf %14, %16 : vector<8x8xf32>
    %cst_11 = arith.constant 0.000000e+00 : f32
    %18 = vector.broadcast %cst_11 : f32 to vector<8x8xf32>
    %19 = arith.maximumf %17, %18 : vector<8x8xf32>
    %20 = vector.broadcast %5 : vector<8x1xf32> to vector<8x8xf32>
    %21 = vector.broadcast %8 : vector<1x8xf32> to vector<8x8xf32>
    %22 = arith.addf %20, %21 : vector<8x8xf32>
    %cst_12 = arith.constant 2.000000e+00 : f32
    %23 = vector.broadcast %cst_12 : f32 to vector<8x8xf32>
    %24 = arith.mulf %23, %10 : vector<8x8xf32>
    %25 = arith.subf %22, %24 : vector<8x8xf32>
    %cst_13 = arith.constant 0.000000e+00 : f32
    %26 = vector.broadcast %cst_13 : f32 to vector<8x8xf32>
    %27 = arith.maximumf %25, %26 : vector<8x8xf32>
    %28 = vector.broadcast %6 : vector<8x1xf32> to vector<8x8xf32>
    %29 = vector.broadcast %8 : vector<1x8xf32> to vector<8x8xf32>
    %30 = arith.addf %28, %29 : vector<8x8xf32>
    %cst_14 = arith.constant 2.000000e+00 : f32
    %31 = vector.broadcast %cst_14 : f32 to vector<8x8xf32>
    %32 = arith.mulf %31, %11 : vector<8x8xf32>
    %33 = arith.subf %30, %32 : vector<8x8xf32>
    %cst_15 = arith.constant 0.000000e+00 : f32
    %34 = vector.broadcast %cst_15 : f32 to vector<8x8xf32>
    %35 = arith.maximumf %33, %34 : vector<8x8xf32>
    %36 = tpu.concatenate %19, %27, %35 in 0 : vector<8x8xf32>, vector<8x8xf32>, vector<8x8xf32> -> vector<24x8xf32>
    %37 = vector.shape_cast %36 : vector<24x8xf32> to vector<1x24x8xf32>
    %cst_16 = arith.constant dense<0.000000e+00> : vector<1xf32>
    %38 = vector.multi_reduction <add>, %37, %cst_16 [1, 2] : vector<1x24x8xf32> to vector<1xf32>
    %39 = vector.shape_cast %38 : vector<1xf32> to vector<1x1x1xf32>
    %40 = vector.extract %39[0, 0, 0] : f32 from vector<1x1x1xf32>
    %41 = vector.shape_cast %27 : vector<8x8xf32> to vector<1x8x8xf32>
    %cst_17 = arith.constant dense<0.000000e+00> : vector<1xf32>
    %42 = vector.multi_reduction <add>, %41, %cst_17 [1, 2] : vector<1x8x8xf32> to vector<1xf32>
    %43 = vector.shape_cast %42 : vector<1xf32> to vector<1x1x1xf32>
    %44 = vector.extract %43[0, 0, 0] : f32 from vector<1x1x1xf32>
    %45 = arith.addf %40, %44 : f32
    %46 = vector.shape_cast %36 : vector<24x8xf32> to vector<1x24x8xf32>
    %cst_18 = arith.constant dense<0xFF800000> : vector<1xf32>
    %47 = vector.multi_reduction <maximumf>, %46, %cst_18 [1, 2] : vector<1x24x8xf32> to vector<1xf32>
    %48 = vector.shape_cast %47 : vector<1xf32> to vector<1x1x1xf32>
    %49 = vector.extract %48[0, 0, 0] : f32 from vector<1x1x1xf32>
    %cst_19 = arith.constant 2.400000e+02 : f32
    %50 = arith.divf %45, %cst_19 : f32
    %cst_20 = arith.constant 4.000000e+00 : f32
    %51 = arith.divf %50, %cst_20 : f32
    %cst_21 = arith.constant 1.000000e+00 : f32
    %52 = arith.mulf %51, %cst_21 : f32
    %cst_22 = arith.constant 9.99999971E-10 : f32
    %53 = arith.addf %52, %cst_22 : f32
    %cst_23 = arith.constant -1.000000e+00 : f32
    %54 = arith.divf %cst_23, %53 : f32
    %55 = vector.broadcast %54 : f32 to vector<24x8xf32>
    %56 = arith.mulf %36, %55 : vector<24x8xf32>
    %57 = math.exp %56 : vector<24x8xf32>
    %cst_24 = arith.constant 2.000000e+00 : f32
    %58 = arith.mulf %51, %cst_24 : f32
    %cst_25 = arith.constant 9.99999971E-10 : f32
    %59 = arith.addf %58, %cst_25 : f32
    %cst_26 = arith.constant -1.000000e+00 : f32
    %60 = arith.divf %cst_26, %59 : f32
    %61 = vector.broadcast %60 : f32 to vector<24x8xf32>
    %62 = arith.mulf %36, %61 : vector<24x8xf32>
    %63 = math.exp %62 : vector<24x8xf32>
    %64 = arith.addf %57, %63 : vector<24x8xf32>
    %cst_27 = arith.constant 4.000000e+00 : f32
    %65 = arith.mulf %51, %cst_27 : f32
    %cst_28 = arith.constant 9.99999971E-10 : f32
    %66 = arith.addf %65, %cst_28 : f32
    %cst_29 = arith.constant -1.000000e+00 : f32
    %67 = arith.divf %cst_29, %66 : f32
    %68 = vector.broadcast %67 : f32 to vector<24x8xf32>
    %69 = arith.mulf %36, %68 : vector<24x8xf32>
    %70 = math.exp %69 : vector<24x8xf32>
    %71 = arith.addf %64, %70 : vector<24x8xf32>
    %cst_30 = arith.constant 8.000000e+00 : f32
    %72 = arith.mulf %51, %cst_30 : f32
    %cst_31 = arith.constant 9.99999971E-10 : f32
    %73 = arith.addf %72, %cst_31 : f32
    %cst_32 = arith.constant -1.000000e+00 : f32
    %74 = arith.divf %cst_32, %73 : f32
    %75 = vector.broadcast %74 : f32 to vector<24x8xf32>
    %76 = arith.mulf %36, %75 : vector<24x8xf32>
    %77 = math.exp %76 : vector<24x8xf32>
    %78 = arith.addf %71, %77 : vector<24x8xf32>
    %cst_33 = arith.constant 1.600000e+01 : f32
    %79 = arith.mulf %51, %cst_33 : f32
    %cst_34 = arith.constant 9.99999971E-10 : f32
    %80 = arith.addf %79, %cst_34 : f32
    %cst_35 = arith.constant -1.000000e+00 : f32
    %81 = arith.divf %cst_35, %80 : f32
    %82 = vector.broadcast %81 : f32 to vector<24x8xf32>
    %83 = arith.mulf %36, %82 : vector<24x8xf32>
    %84 = math.exp %83 : vector<24x8xf32>
    %85 = arith.addf %78, %84 : vector<24x8xf32>
    %86 = vector.extract_strided_slice %85 {offsets = [0, 0], sizes = [8, 8], strides = [1, 1]} : vector<24x8xf32> to vector<8x8xf32>
    %87 = vector.shape_cast %86 : vector<8x8xf32> to vector<1x8x8xf32>
    %cst_36 = arith.constant dense<0.000000e+00> : vector<1xf32>
    %88 = vector.multi_reduction <add>, %87, %cst_36 [1, 2] : vector<1x8x8xf32> to vector<1xf32>
    %89 = vector.shape_cast %88 : vector<1xf32> to vector<1x1x1xf32>
    %90 = vector.extract %89[0, 0, 0] : f32 from vector<1x1x1xf32>
    %cst_37 = arith.constant 6.400000e+01 : f32
    %91 = arith.divf %90, %cst_37 : f32
    %92 = vector.extract_strided_slice %85 {offsets = [8, 0], sizes = [8, 8], strides = [1, 1]} : vector<24x8xf32> to vector<8x8xf32>
    %93 = vector.shape_cast %92 : vector<8x8xf32> to vector<1x8x8xf32>
    %cst_38 = arith.constant dense<0.000000e+00> : vector<1xf32>
    %94 = vector.multi_reduction <add>, %93, %cst_38 [1, 2] : vector<1x8x8xf32> to vector<1xf32>
    %95 = vector.shape_cast %94 : vector<1xf32> to vector<1x1x1xf32>
    %96 = vector.extract %95[0, 0, 0] : f32 from vector<1x1x1xf32>
    %cst_39 = arith.constant 6.400000e+01 : f32
    %97 = arith.divf %96, %cst_39 : f32
    %98 = vector.extract_strided_slice %85 {offsets = [16, 0], sizes = [8, 8], strides = [1, 1]} : vector<24x8xf32> to vector<8x8xf32>
    %99 = vector.shape_cast %98 : vector<8x8xf32> to vector<1x8x8xf32>
    %cst_40 = arith.constant dense<0.000000e+00> : vector<1xf32>
    %100 = vector.multi_reduction <add>, %99, %cst_40 [1, 2] : vector<1x8x8xf32> to vector<1xf32>
    %101 = vector.shape_cast %100 : vector<1xf32> to vector<1x1x1xf32>
    %102 = vector.extract %101[0, 0, 0] : f32 from vector<1x1x1xf32>
    %cst_41 = arith.constant 6.400000e+01 : f32
    %103 = arith.divf %102, %cst_41 : f32
    %104 = arith.addf %91, %103 : f32
    %105 = arith.subf %104, %97 : f32
    %106 = arith.subf %105, %97 : f32
    %c0_42 = arith.constant 0 : index
    %107 = memref.load %arg2[%c0_42] : memref<6xf32, #tpu.memory_space<smem>>
    memref.store %106, %arg2[%c0_42] : memref<6xf32, #tpu.memory_space<smem>>
    %c1 = arith.constant 1 : index
    %108 = memref.load %arg2[%c1] : memref<6xf32, #tpu.memory_space<smem>>
    memref.store %49, %arg2[%c1] : memref<6xf32, #tpu.memory_space<smem>>
    %c2 = arith.constant 2 : index
    %109 = memref.load %arg2[%c2] : memref<6xf32, #tpu.memory_space<smem>>
    memref.store %91, %arg2[%c2] : memref<6xf32, #tpu.memory_space<smem>>
    %c3 = arith.constant 3 : index
    %110 = memref.load %arg2[%c3] : memref<6xf32, #tpu.memory_space<smem>>
    memref.store %103, %arg2[%c3] : memref<6xf32, #tpu.memory_space<smem>>
    %c4 = arith.constant 4 : index
    %111 = memref.load %arg2[%c4] : memref<6xf32, #tpu.memory_space<smem>>
    memref.store %97, %arg2[%c4] : memref<6xf32, #tpu.memory_space<smem>>
    %c5 = arith.constant 5 : index
    %112 = memref.load %arg2[%c5] : memref<6xf32, #tpu.memory_space<smem>>
    memref.store %97, %arg2[%c5] : memref<6xf32, #tpu.memory_space<smem>>
    return
  }
}

</mosaic_0001>

<bundles_post_ra>
// kernel: tpu_custom_call.1
= control target key start
LH: loop header
LB: loop body
LE: loop exit
PB: predicated region body
PF: predicated region fallthrough
CT: control target
= control target key end

     0   :  { %7 = vsyncpa [#allocation3], 0  ;;  %s3173_s0 = inlined_call_operand.hbm [shape: f32[8,32], index: 0, kind: input, shape index: {}]   ;;  %s3174_s1 = inlined_call_operand.hbm [shape: f32[8,32], index: 1, kind: input, shape index: {}]   ;;  %s3175_s2 = inlined_call_operand.hbm [shape: f32[6], index: 2, kind: output, shape index: {}]  }
   0x1   :  { %8 = vsyncpa [#allocation6], 0 }
   0x2   :  { %9 = vsyncpa [#allocation4], 0  ;;  %s2911_s9 = smov [#allocation2]   ;;  %s2912_s11 = smov [#allocation5]  }
   0x3   :  { %s16_s10 = sshll.u32 %s2911_s9, 4  ;;  %s26_s12 = sshll.u32 %s2912_s11, 4  ;;  %s17_s10 = int_to_ptr.vmem [resolvable:$true] %s16_s10  ;;  %s27_s12 = int_to_ptr.vmem [resolvable:$true] %s26_s12 }
   0x4   :  { %s2851_s15 = scalar_lea.hbm %s3173_s0, 128 }
   0x5   :  { %p2852_p0 = scmp.ne.s32.totalorder %s3173_s0, %s2851_s15  ;;  %p2855_p1 = scmp.lt.u32.totalorder %s2851_s15, %s3173_s0 }
   0x7   :  { %p2857_p2 = pnand %p2855_p1, %p2852_p0 }
   0x9   :  { %2860 = shalt.err (!%p2857_p2)
}
   0xa   :  { %s2861_s20 = scalar_lea.vmem %s17_s10, 128  ;;  %p2866_p4 = scmp.lt.s32.totalorder %s17_s10, %s17_s10 }
   0xb   :  { %p2862_p3 = scmp.ne.s32.totalorder %s17_s10, %s2861_s20  ;;  %p2867_p5 = scmp.lt.s32.totalorder %s2861_s20, %s2861_s20 }
   0xd   :  { %p2868_p6 = por %p2867_p5, %p2866_p4 }
   0xf   :  { %p2869_p7 = pnand %p2868_p6, %p2862_p3 }
  0x11   :  { %2872 = shalt.err (!%p2869_p7)
}
  0x12   :  { %19 = dma.hbm_to_vmem [thread:$0]  %s3173_s0, 128, %s17_s10, [#allocation3]  }
  0x13   :  { %s2873_s25 = scalar_lea.hbm %s3174_s1, 128 }
  0x14   :  { %p2874_p8 = scmp.ne.s32.totalorder %s3174_s1, %s2873_s25  ;;  %p2877_p9 = scmp.lt.u32.totalorder %s2873_s25, %s3174_s1 }
  0x16   :  { %p2879_p10 = pnand %p2877_p9, %p2874_p8 }
  0x18   :  { %2882 = shalt.err (!%p2879_p10)
}
  0x19   :  { %s2883_s30 = scalar_lea.vmem %s27_s12, 128  ;;  %p2888_p12 = scmp.lt.s32.totalorder %s27_s12, %s27_s12 }
  0x1a   :  { %p2884_p11 = scmp.ne.s32.totalorder %s27_s12, %s2883_s30  ;;  %p2889_p13 = scmp.lt.s32.totalorder %s2883_s30, %s2883_s30 }
  0x1c   :  { %p2890_p0 = por %p2889_p13, %p2888_p12 }
  0x1e   :  { %p2891_p1 = pnand %p2890_p0, %p2884_p11 }
  0x20   :  { %2894 = shalt.err (!%p2891_p1)
}
  0x21   :  { %29 = dma.hbm_to_vmem [thread:$0]  %s3174_s1, 128, %s27_s12, [#allocation6]  }
  0x22   :  { %2905 = dma.done.wait [#allocation3], 128  }
  0x23   :  { %2906 = vsyncadd [#allocation3], 4294967168 }
  0x24   :  { %2907 = dma.done.wait [#allocation6], 128  }
  0x25   :  { %2908 = vsyncadd [#allocation6], 4294967168  ;;  %vm40_vm0 = vcmask 261120   ;;  %v2913_v0 = vmov 0.0   ;;  %v2914_v1 = vmov 0   ;;  %vm2915_vm1 = vmmov 0  }
  0x26   :  { %2583 = vmatprep.subr.mxu1 %v2913_v0  ;;  %2598 = vmatprep.subr.mxu0 %v2913_v0  ;;  %v48_v2 = vsel %vm40_vm0, 1.0, %v2914_v1  ;;  %v36_v5 = vld [vmem:[#allocation2] sm:$0xff]  ;;  %v2969_v6 = vld [vmem:[#allocation5] sm:$0xff]  ;;  %v2916_v25 = vmov 1.0   ;;  %v2292_v43 = vlaneseq  ;;  %vm2312_vm2 = vcmask 64512  }
  0x27   :  { %2585 = vmatprep.mubr.msk.f32.mxu1 %vm2915_vm1, %v2913_v0  ;;  %2600 = vmatprep.mubr.msk.f32.mxu0 %vm2915_vm1, %v2913_v0  ;;  %v2964_v3 = vsub.f32 %v48_v2, %v48_v2  ;;  %v38_v7 = vmul.f32 %v36_v5, %v36_v5  ;;  %v39_v10 = vmul.f32 %v2969_v6, %v2969_v6  ;;  %v949_v16 = vsel %vm40_vm0, %v36_v5, 0 }
  0x28   :  { %v2982_v19 = vand.u32 4294901760, %v949_v16  ;;  %v1398_v32 = vsel %vm40_vm0, %v2969_v6, 0  ;;  %v2293_v44 = vshrl.u32 %v2292_v43, 7 }
  0x29   :  { %v2967_v4 = vand.u32 4294901760, %v2964_v3  ;;  %v51_v9 = vsel %vm40_vm0, %v38_v7, 0  ;;  %v41_v11 = vsel %vm40_vm0, %v38_v7, 0.0  ;;  %v44_v14 = vsel %vm40_vm0, %v39_v10, 0.0 }
  0x2a   :  { %v54_v12 = vand.u32 4294901760, %v51_v9  ;;  %42 = vadd.xlane.f32.xlu0 %v41_v11  ;;  %v500_v17 = vsel %vm40_vm0, %v39_v10, 0  ;;  %v2993_v23 = vsub.f32 %v949_v16, %v2982_v19  ;;  %v3051_v33 = vand.u32 4294901760, %v1398_v32 }
  0x2b   :  { %v122_v8 = vsub.f32 %v2964_v3, %v2967_v4  ;;  %v2987_v21 = vand.u32 4294901760, %v500_v17  ;;  %v2294_v45 = vsub.s32 0, %v2293_v44 }
  0x2c   :  { %2584 = vmatpush3.xpose.msra.mxu1 %v54_v12  ;;  %v131_v15 = vsub.f32 %v51_v9, %v54_v12  ;;  %2599 = vmatpush3.xpose.msra.mxu0 %v54_v12  ;;  %v3002_v26 = vand.u32 4294901760, %v2993_v23  ;;  %v1478_v34 = vsub.f32 %v1398_v32, %v3051_v33 }
  0x2d   :  { %v123_v13 = vand.u32 4294901760, %v122_v8  ;;  %2588 = vmatprep.subr.mxu1 %v2913_v0  ;;  %2603 = vmatprep.subr.mxu0 %v2913_v0  ;;  %v580_v24 = vsub.f32 %v500_v17, %v2987_v21 }
  0x2e   :  { %v132_v18 = vand.u32 4294901760, %v131_v15  ;;  %45 = vadd.xlane.f32.xlu0 %v44_v14  ;;  %v1020_v28 = vsub.f32 %v2993_v23, %v3002_v26  ;;  %v1479_v35 = vand.u32 4294901760, %v1478_v34 }
  0x2f   :  { %2586 = vmatmul.mubr.f32.vlgmr.msra.gmra.mrb[0].mxu1 %v123_v13  ;;  %2601 = vmatmul.mubr.f32.vlgmr.msra.gmra.mrb[0].mxu0 %v2967_v4  ;;  %v581_v27 = vand.u32 4294901760, %v580_v24 }
  0x30   :  { %v133_v20 = vsub.f32 %v131_v15, %v132_v18  ;;  %2604 = vmatpush3.xpose.msra.mxu0 %v132_v18  ;;  %2590 = vmatprep.mubr.msk.f32.mxu1 %vm2915_vm1, %v2913_v0  ;;  %v1021_v30 = vand.u32 4294901760, %v1020_v28  ;;  %v1480_v36 = vsub.f32 %v1478_v34, %v1479_v35 }
  0x31   :  { %2605 = vmatprep.mubr.msk.f32.mxu0 %vm2915_vm1, %v2913_v0  ;;  %2608 = vmatprep.subr.mxu0 %v2913_v0  ;;  %v582_v29 = vsub.f32 %v580_v24, %v581_v27 }
  0x32   :  { %v134_v22 = vand.u32 4294901760, %v133_v20  ;;  %v1481_v37 = vand.u32 4294901760, %v1480_v36 }
  0x33   :  { %v583_v31 = vand.u32 4294901760, %v582_v29 }
  0x34   :  { %2589 = vmatpush3.xpose.msra.mxu1 %v134_v22 }
  0x35   :  { %2593 = vmatprep.subr.mxu1 %v2913_v0 }
  0x37   :  { %2591 = vmatmul.mubr.msk.f32.vlgmr.msra.gmra.mrb[0].mxu1 %vm40_vm0, %v2916_v25  ;;  %2606 = vmatmul.mubr.msk.f32.vlgmr.msra.gmra.mrb[0].mxu0 %vm40_vm0, %v2916_v25 }
  0x38   :  { %2594 = vmatpush3.xpose.msra.mxu1 %v131_v15  ;;  %2609 = vmatpush3.xpose.msra.mxu0 %v54_v12 }
  0x39   :  { %2595 = vmatprep.mubr.msk.f32.mxu1 %vm2915_vm1, %v2913_v0  ;;  %2610 = vmatprep.mubr.msk.f32.mxu0 %vm2915_vm1, %v2913_v0 }
  0x3a   :  { %2613 = vmatprep.subr.mxu1 %v2913_v0  ;;  %2643 = vmatprep.subr.mxu0 %v2913_v0 }
  0x3f   :  { %2596 = vmatmul.mubr.f32.vlgmr.msra.gmra.mrb[0].mxu1 %v2964_v3  ;;  %2611 = vmatmul.mubr.msk.f32.vlgmr.msra.gmra.mrb[0].mxu0 %vm40_vm0, %v2916_v25 }
  0x40   :  { %2614 = vmatpush3.xpose.msra.mxu1 %v2987_v21  ;;  %2644 = vmatpush3.xpose.msra.mxu0 %v2982_v19 }
  0x41   :  { %2615 = vmatprep.mubr.msk.f32.mxu1 %vm2915_vm1, %v2913_v0  ;;  %2645 = vmatprep.mubr.msk.f32.mxu0 %vm2915_vm1, %v2913_v0 }
  0x42   :  { %2618 = vmatprep.subr.mxu1 %v2913_v0  ;;  %2648 = vmatprep.subr.mxu0 %v2913_v0 }
  0x43   :  { %2616 = vmatmul.mubr.f32.vlgmr.msra.gmra.mrb[2].mxu1 %v123_v13  ;;  %2646 = vmatmul.mubr.f32.vlgmr.msra.gmra.mrb[2].mxu0 %v1021_v30 }
  0x44   :  { %2619 = vmatpush3.xpose.msra.mxu1 %v583_v31  ;;  %2649 = vmatpush3.xpose.msra.mxu0 %v1021_v30 }
  0x45   :  { %2620 = vmatprep.mubr.msk.f32.mxu1 %vm2915_vm1, %v2913_v0  ;;  %2650 = vmatprep.mubr.msk.f32.mxu0 %vm2915_vm1, %v2913_v0 }
  0x46   :  { %2623 = vmatprep.subr.mxu1 %v2913_v0  ;;  %2653 = vmatprep.subr.mxu0 %v2913_v0 }
  0x4b   :  { %2621 = vmatmul.mubr.msk.f32.vlgmr.msra.gmra.mrb[2].mxu1 %vm40_vm0, %v2916_v25  ;;  %2651 = vmatmul.mubr.f32.vlgmr.msra.gmra.mrb[2].mxu0 %v2982_v19 }
  0x4c   :  { %2624 = vmatpush3.xpose.msra.mxu1 %v580_v24  ;;  %2654 = vmatpush3.xpose.msra.mxu0 %v2993_v23 }
  0x4d   :  { %2625 = vmatprep.mubr.msk.f32.mxu1 %vm2915_vm1, %v2913_v0  ;;  %2655 = vmatprep.mubr.msk.f32.mxu0 %vm2915_vm1, %v2913_v0 }
  0x4e   :  { %2628 = vmatprep.subr.mxu1 %v2913_v0  ;;  %2658 = vmatprep.subr.mxu0 %v2913_v0 }
  0x53   :  { %2626 = vmatmul.mubr.f32.vlgmr.msra.gmra.mrb[2].mxu1 %v2964_v3  ;;  %2656 = vmatmul.mubr.f32.vlgmr.msra.gmra.mrb[2].mxu0 %v2993_v23 }
  0x54   :  { %2629 = vmatpush3.xpose.msra.mxu1 %v2987_v21  ;;  %2659 = vmatpush3.xpose.msra.mxu0 %v2982_v19 }
  0x55   :  { %2630 = vmatprep.mubr.msk.f32.mxu1 %vm2915_vm1, %v2913_v0  ;;  %2660 = vmatprep.mubr.msk.f32.mxu0 %vm2915_vm1, %v2913_v0 }
  0x56   :  { %2633 = vmatprep.subr.mxu1 %v2913_v0  ;;  %2663 = vmatprep.subr.mxu0 %v2913_v0 }
  0x5b   :  { %2631 = vmatmul.mubr.f32.vlgmr.msra.gmra.mrb[2].mxu1 %v2967_v4  ;;  %2661 = vmatmul.mubr.f32.vlgmr.msra.gmra.mrb[2].mxu0 %v3002_v26 }
  0x5c   :  { %2634 = vmatpush3.xpose.msra.mxu1 %v581_v27  ;;  %2664 = vmatpush3.xpose.msra.mxu0 %v3002_v26 }
  0x5d   :  { %2635 = vmatprep.mubr.msk.f32.mxu1 %vm2915_vm1, %v2913_v0  ;;  %2665 = vmatprep.mubr.msk.f32.mxu0 %vm2915_vm1, %v2913_v0 }
  0x5e   :  { %2638 = vmatprep.subr.mxu1 %v2913_v0  ;;  %2668 = vmatprep.subr.mxu0 %v2913_v0 }
  0x63   :  { %2636 = vmatmul.mubr.msk.f32.vlgmr.msra.gmra.mrb[2].mxu1 %vm40_vm0, %v2916_v25  ;;  %2666 = vmatmul.mubr.f32.vlgmr.msra.gmra.mrb[2].mxu0 %v2982_v19 }
  0x64   :  { %2639 = vmatpush3.xpose.msra.mxu1 %v2987_v21  ;;  %2669 = vmatpush3.xpose.msra.mxu0 %v2982_v19 }
  0x65   :  { %2640 = vmatprep.mubr.msk.f32.mxu1 %vm2915_vm1, %v2913_v0  ;;  %2670 = vmatprep.mubr.msk.f32.mxu0 %vm2915_vm1, %v2913_v0 }
  0x66   :  { %2673 = vmatprep.subr.mxu1 %v2913_v0  ;;  %2703 = vmatprep.subr.mxu0 %v2913_v0 }
  0x6b   :  { %2641 = vmatmul.mubr.msk.f32.vlgmr.msra.gmra.mrb[2].mxu1 %vm40_vm0, %v2916_v25  ;;  %2671 = vmatmul.mubr.f32.vlgmr.msra.gmra.mrb[2].mxu0 %v2982_v19 }
  0x6c   :  { %2674 = vmatpush3.xpose.msra.mxu1 %v3051_v33  ;;  %2704 = vmatpush3.xpose.msra.mxu0 %v3051_v33 }
  0x6d   :  { %2675 = vmatprep.mubr.msk.f32.mxu1 %vm2915_vm1, %v2913_v0  ;;  %2705 = vmatprep.mubr.msk.f32.mxu0 %vm2915_vm1, %v2913_v0 }
  0x6e   :  { %2678 = vmatprep.subr.mxu1 %v2913_v0  ;;  %2708 = vmatprep.subr.mxu0 %v2913_v0 }
  0x6f   :  { %2676 = vmatmul.mubr.f32.vlgmr.msra.gmra.mrb[4].mxu1 %v1021_v30  ;;  %2706 = vmatmul.mubr.f32.vlgmr.msra.gmra.mrb[4].mxu0 %v1481_v37 }
  0x70   :  { %2679 = vmatpush3.xpose.msra.mxu1 %v1481_v37  ;;  %2709 = vmatpush3.xpose.msra.mxu0 %v1481_v37 }
  0x71   :  { %2680 = vmatprep.mubr.msk.f32.mxu1 %vm2915_vm1, %v2913_v0  ;;  %2710 = vmatprep.mubr.msk.f32.mxu0 %vm2915_vm1, %v2913_v0 }
  0x72   :  { %2683 = vmatprep.subr.mxu1 %v2913_v0  ;;  %2713 = vmatprep.subr.mxu0 %v2913_v0 }
  0x77   :  { %2681 = vmatmul.mubr.f32.vlgmr.msra.gmra.mrb[4].mxu1 %v2982_v19  ;;  %2711 = vmatmul.mubr.f32.vlgmr.msra.gmra.mrb[4].mxu0 %v3051_v33 }
  0x78   :  { %2684 = vmatpush3.xpose.msra.mxu1 %v1478_v34  ;;  %2714 = vmatpush3.xpose.msra.mxu0 %v1478_v34 }
  0x79   :  { %2685 = vmatprep.mubr.msk.f32.mxu1 %vm2915_vm1, %v2913_v0  ;;  %2715 = vmatprep.mubr.msk.f32.mxu0 %vm2915_vm1, %v2913_v0 }
  0x7a   :  { %2688 = vmatprep.subr.mxu1 %v2913_v0  ;;  %2718 = vmatprep.subr.mxu0 %v2913_v0 }
  0x7f   :  { %2686 = vmatmul.mubr.f32.vlgmr.msra.gmra.mrb[4].mxu1 %v2993_v23  ;;  %2716 = vmatmul.mubr.f32.vlgmr.msra.gmra.mrb[4].mxu0 %v1478_v34 }
  0x80   :  { %2689 = vmatpush3.xpose.msra.mxu1 %v3051_v33  ;;  %2719 = vmatpush3.xpose.msra.mxu0 %v3051_v33 }
  0x81   :  { %2690 = vmatprep.mubr.msk.f32.mxu1 %vm2915_vm1, %v2913_v0  ;;  %2720 = vmatprep.mubr.msk.f32.mxu0 %vm2915_vm1, %v2913_v0 }
  0x82   :  { %2693 = vmatprep.subr.mxu1 %v2913_v0  ;;  %2723 = vmatprep.subr.mxu0 %v2913_v0 }
  0x87   :  { %2691 = vmatmul.mubr.f32.vlgmr.msra.gmra.mrb[4].mxu1 %v3002_v26  ;;  %2721 = vmatmul.mubr.f32.vlgmr.msra.gmra.mrb[4].mxu0 %v1479_v35 }
  0x88   :  { %2694 = vmatpush3.xpose.msra.mxu1 %v1479_v35  ;;  %2724 = vmatpush3.xpose.msra.mxu0 %v1479_v35 }
  0x89   :  { %2695 = vmatprep.mubr.msk.f32.mxu1 %vm2915_vm1, %v2913_v0  ;;  %2725 = vmatprep.mubr.msk.f32.mxu0 %vm2915_vm1, %v2913_v0 }
  0x8a   :  { %2698 = vmatprep.subr.mxu1 %v2913_v0  ;;  %2728 = vmatprep.subr.mxu0 %v2913_v0 }
  0x8f   :  { %2696 = vmatmul.mubr.f32.vlgmr.msra.gmra.mrb[4].mxu1 %v2982_v19  ;;  %2726 = vmatmul.mubr.f32.vlgmr.msra.gmra.mrb[4].mxu0 %v3051_v33 }
  0x90   :  { %2699 = vmatpush3.xpose.msra.mxu1 %v3051_v33  ;;  %2729 = vmatpush3.xpose.msra.mxu0 %v3051_v33 }
  0x91   :  { %2700 = vmatprep.mubr.msk.f32.mxu1 %vm2915_vm1, %v2913_v0  ;;  %2730 = vmatprep.mubr.msk.f32.mxu0 %vm2915_vm1, %v2913_v0 }
  0x97   :  { %2701 = vmatmul.mubr.f32.vlgmr.msra.gmra.mrb[4].mxu1 %v2982_v19  ;;  %2731 = vmatmul.mubr.f32.vlgmr.msra.gmra.mrb[4].mxu0 %v3051_v33 }
  0xb7   :  { %v43_v47 = vpop.xlane.xlu0 %42 }
  0xbb   :  { %v46_v56 = vpop.xlane.xlu0 %45 }
 0x112   :  { %v275_v38 = vpop.f32.mrb[0].mxu1  ;;  %v495_v39 = vpop.f32.mrb[0].mxu0 }
 0x113   :  { %v2733_v40 = vadd.f32 %v495_v39, %v275_v38  ;;  %v2597_v41 = vpop.f32.mrb[1].mxu1  ;;  %v2612_v42 = vpop.f32.mrb[1].mxu0 }
 0x115   :  { %v2295_v46 = vrot.slane %v2733_v40, %v2294_v45 }
 0x117   :  { %v2296_v50 = vadd.f32 %v2295_v46, %v43_v47 }
 0x13e   :  { %v944_v48 = vpop.f32.mrb[2].mxu1  ;;  %v1393_v49 = vpop.f32.mrb[2].mxu0 }
 0x13f   :  { %v2297_v51 = vmul.f32 2.0, %v1393_v49  ;;  %v2642_v52 = vpop.f32.mrb[3].mxu1  ;;  %v2672_v53 = vpop.f32.mrb[3].mxu0  ;;  %v2303_v55 = vrot.slane %v944_v48, %v2294_v45 }
 0x141   :  { %v2298_v54 = vsub.f32 %v2296_v50, %v2297_v51  ;;  %v2304_v59 = vadd.f32 %v2303_v55, %v43_v47  ;;  %v2308_v60 = vadd.f32 %v2303_v55, %v46_v56 }
 0x143   :  { %v3125_v1 = vmax.f32 %v2298_v54, 0.0 }
 0x145   :  { %v2337_v6 = vsel %vm2312_vm2, %v3125_v1, -inf  ;;  %v2313_v8 = vsel %vm2312_vm2, %v3125_v1, 0.0 }
 0x16a   :  { %v1842_v57 = vpop.f32.mrb[4].mxu1  ;;  %v2288_v58 = vpop.f32.mrb[4].mxu0 }
 0x16b   :  { %v2305_v61 = vmul.f32 2.0, %v1842_v57  ;;  %v2309_v62 = vmul.f32 2.0, %v2288_v58  ;;  %v2702_v63 = vpop.f32.mrb[5].mxu1  ;;  %v2732_v0 = vpop.f32.mrb[5].mxu0 }
 0x16d   :  { %v2306_v2 = vsub.f32 %v2304_v59, %v2305_v61  ;;  %v2310_v3 = vsub.f32 %v2308_v60, %v2309_v62 }
 0x16f   :  { %v3127_v4 = vmax.f32 %v2306_v2, 0.0  ;;  %v3129_v5 = vmax.f32 %v2310_v3, 0.0 }
 0x171   :  { %v2338_v7 = vsel %vm2312_vm2, %v3127_v4, -inf  ;;  %v2314_v9 = vsel %vm2312_vm2, %v3127_v4, 0.0  ;;  %v2339_v12 = vsel %vm2312_vm2, %v3129_v5, -inf  ;;  %v2316_v13 = vsel %vm2312_vm2, %v3129_v5, 0.0 }
 0x172   :  { %v2340_v10 = vmax.f32 %v2337_v6, %v2338_v7  ;;  %v2315_v11 = vadd.f32 %v2314_v9, %v2313_v8 }
 0x174   :  { %v2341_v14 = vmax.f32 %v2340_v10, %v2339_v12  ;;  %v2317_v15 = vadd.f32 %v2316_v13, %v2315_v11 }
 0x176   :  { %2342 = vmax.xlane.f32.xlu0 %v2341_v14  ;;  %2318 = vadd.xlane.f32.xlu1 %v2317_v15 }
 0x17a   :  { %2327 = vadd.xlane.f32.xlu1 %v2314_v9 }
 0x203   :  { %v2343_v16 = vpop.xlane.xlu0 %2342  ;;  %v2319_v17 = vpop.xlane.xlu1 %2318 }
 0x204   :  { %v2344_v18 = vrot.slane %v2343_v16, 4  ;;  %v2320_v19 = vrot.slane %v2319_v17, 4 }
 0x206   :  { %v2345_v20 = vmax.f32 %v2343_v16, %v2344_v18  ;;  %v2321_v21 = vadd.f32 %v2320_v19, %v2319_v17 }
 0x207   :  { %v2328_v22 = vpop.xlane.xlu1 %2327 }
 0x208   :  { %v2346_v23 = vrot.slane %v2345_v20, 2  ;;  %v2322_v24 = vrot.slane %v2321_v21, 2  ;;  %v2329_v25 = vrot.slane %v2328_v22, 4 }
 0x20a   :  { %v2330_v26 = vadd.f32 %v2329_v25, %v2328_v22  ;;  %v2323_v27 = vadd.f32 %v2322_v24, %v2321_v21  ;;  %v2347_v28 = vmax.f32 %v2345_v20, %v2346_v23 }
 0x20c   :  { %v2331_v29 = vrot.slane %v2330_v26, 2  ;;  %v2324_v30 = vrot.slane %v2323_v27, 1  ;;  %v2348_v33 = vrot.slane %v2347_v28, 1 }
 0x20e   :  { %v2325_v31 = vadd.f32 %v2324_v30, %v2323_v27  ;;  %v2332_v32 = vadd.f32 %v2331_v29, %v2330_v26  ;;  %v2349_v36 = vmax.f32 %v2347_v28, %v2348_v33 }
 0x210   :  { %2782 = vpush %v2325_v31  ;;  %v2333_v34 = vrot.slane %v2332_v32, 1 }
 0x212   :  { %v2334_v35 = vadd.f32 %v2333_v34, %v2332_v32 }
 0x214   :  { %2784 = vpush %v2334_v35 }
 0x215   :  { %2786 = vpush %v2349_v36 }
 0x241   :  { %s2783_s1 = spop %2782 }
 0x245   :  { %s2785_s4 = spop %2784 }
 0x246   :  { %s2336_s5 = sadd.f32 %s2785_s4, %s2783_s1  ;;  %s2787_s6 = spop %2786 }
 0x247   :  { %2493 = sst [smem:[#allocation7 + $0x1]] %s2787_s6 }
 0x248   :  { %s2353_s7 = smul.f32 0.004166667, %s2336_s5 }
 0x24a   :  { %s2356_s8 = smul.f32 0.25, %s2353_s7 }
 0x24c   :  { %s2357_s9 = sadd.f32 1e-09, %s2356_s8  ;;  %s2372_s10 = smul.f32 2.0, %s2356_s8 }
 0x24d   :  { %s2391_s11 = smul.f32 4.0, %s2356_s8 }
 0x24e   :  { %v2358_v37 = vstv %s2357_s9  ;;  %s2373_s12 = sadd.f32 1e-09, %s2372_s10  ;;  %s2410_s13 = smul.f32 8.0, %s2356_s8 }
 0x24f   :  { %2811 = vrcp.f32 %v2358_v37  ;;  %s2392_s14 = sadd.f32 1e-09, %s2391_s11  ;;  %s2429_s15 = smul.f32 16.0, %s2356_s8 }
 0x250   :  { %v2374_v38 = vstv %s2373_s12  ;;  %s2411_s16 = sadd.f32 1e-09, %s2410_s13  ;;  %s2895_s9 = scalar_lea.hbm %s3175_s2, 16 }
 0x251   :  { %2813 = vrcp.f32 %v2374_v38  ;;  %v2393_v39 = vstv %s2392_s14  ;;  %s2430_s17 = sadd.f32 1e-09, %s2429_s15  ;;  %p2896_p2 = scmp.ne.s32.totalorder %s3175_s2, %s2895_s9 }
 0x252   :  { %2815 = vrcp.f32 %v2393_v39  ;;  %v2412_v40 = vstv %s2411_s16  ;;  %p2899_p3 = scmp.lt.u32.totalorder %s2895_s9, %s3175_s2 }
 0x253   :  { %2817 = vrcp.f32 %v2412_v40  ;;  %v2431_v41 = vstv %s2430_s17 }
 0x254   :  { %2819 = vrcp.f32 %v2431_v41  ;;  %p2901_p4 = pnand %p2899_p3, %p2896_p2 }
 0x259   :  { %v2812_v42 = vpop.eup %2811 }
 0x25a   :  { %2788 = vpush %v2812_v42 }
 0x25b   :  { %v2814_v43 = vpop.eup %2813 }
 0x25c   :  { %v2816_v44 = vpop.eup %2815  ;;  %2790 = vpush %v2814_v43 }
 0x25d   :  { %v2818_v45 = vpop.eup %2817  ;;  %2792 = vpush %v2816_v44 }
 0x25e   :  { %v2820_v46 = vpop.eup %2819  ;;  %2794 = vpush %v2818_v45 }
 0x25f   :  { %2796 = vpush %v2820_v46 }
 0x28b   :  { %s2789_s18 = spop %2788 }
 0x28c   :  { %s2361_s19 = smul.f32 -1.0, %s2789_s18 }
 0x28d   :  { %s2791_s20 = spop %2790 }
 0x28e   :  { %v2362_v47 = vstv %s2361_s19  ;;  %s2377_s21 = smul.f32 -1.0, %s2791_s20  ;;  %s2793_s22 = spop %2792 }
 0x28f   :  { %v2363_v48 = vmul.f32 %v2362_v47, %v3125_v1  ;;  %v2364_v49 = vmul.f32 %v2362_v47, %v3127_v4  ;;  %v2365_v50 = vmul.f32 %v2362_v47, %v3129_v5  ;;  %s2396_s23 = smul.f32 -1.0, %s2793_s22  ;;  %s2795_s24 = spop %2794 }
 0x290   :  { %v2378_v51 = vstv %s2377_s21  ;;  %s2415_s25 = smul.f32 -1.0, %s2795_s24  ;;  %s2797_s26 = spop %2796 }
 0x291   :  { %v2366_v52 = vmul.f32 1.442695, %v2363_v48  ;;  %v2368_v53 = vmul.f32 1.442695, %v2364_v49  ;;  %v2370_v54 = vmul.f32 1.442695, %v2365_v50  ;;  %v2379_v55 = vmul.f32 %v2378_v51, %v3125_v1 }
 0x292   :  { %v2380_v56 = vmul.f32 %v2378_v51, %v3127_v4  ;;  %v2381_v57 = vmul.f32 %v2378_v51, %v3129_v5  ;;  %v2397_v58 = vstv %s2396_s23  ;;  %v2416_v59 = vstv %s2415_s25  ;;  %s2434_s27 = smul.f32 -1.0, %s2797_s26 }
 0x293   :  { %2821 = vpow2.f32 %v2366_v52  ;;  %v2382_v60 = vmul.f32 1.442695, %v2379_v55  ;;  %v2398_v61 = vmul.f32 %v2397_v58, %v3125_v1  ;;  %v2399_v62 = vmul.f32 %v2397_v58, %v3127_v4 }
 0x294   :  { %2823 = vpow2.f32 %v2368_v53  ;;  %v2384_v63 = vmul.f32 1.442695, %v2380_v56  ;;  %v2386_v0 = vmul.f32 1.442695, %v2381_v57  ;;  %v2400_v2 = vmul.f32 %v2397_v58, %v3129_v5 }
 0x295   :  { %2825 = vpow2.f32 %v2370_v54  ;;  %v2401_v3 = vmul.f32 1.442695, %v2398_v61  ;;  %v2417_v6 = vmul.f32 %v2416_v59, %v3125_v1  ;;  %v2403_v7 = vmul.f32 1.442695, %v2399_v62 }
 0x296   :  { %2827 = vpow2.f32 %v2382_v60  ;;  %v2418_v8 = vmul.f32 %v2416_v59, %v3127_v4  ;;  %v2419_v9 = vmul.f32 %v2416_v59, %v3129_v5  ;;  %v2405_v10 = vmul.f32 1.442695, %v2400_v2 }
 0x297   :  { %2829 = vpow2.f32 %v2384_v63  ;;  %v2435_v11 = vstv %s2434_s27  ;;  %v2420_v12 = vmul.f32 1.442695, %v2417_v6 }
 0x298   :  { %2831 = vpow2.f32 %v2386_v0  ;;  %v2436_v13 = vmul.f32 %v2435_v11, %v3125_v1  ;;  %v2422_v14 = vmul.f32 1.442695, %v2418_v8  ;;  %v2437_v15 = vmul.f32 %v2435_v11, %v3127_v4 }
 0x299   :  { %2833 = vpow2.f32 %v2401_v3  ;;  %v2438_v16 = vmul.f32 %v2435_v11, %v3129_v5  ;;  %v2424_v17 = vmul.f32 1.442695, %v2419_v9 }
 0x29a   :  { %2835 = vpow2.f32 %v2403_v7  ;;  %v2439_v18 = vmul.f32 1.442695, %v2436_v13  ;;  %v2441_v19 = vmul.f32 1.442695, %v2437_v15 }
 0x29b   :  { %2837 = vpow2.f32 %v2405_v10  ;;  %v2443_v21 = vmul.f32 1.442695, %v2438_v16 }
 0x29c   :  { %2839 = vpow2.f32 %v2420_v12 }
 0x29d   :  { %v2822_v20 = vpop.eup %2821  ;;  %2841 = vpow2.f32 %v2422_v14 }
 0x29e   :  { %v2824_v22 = vpop.eup %2823  ;;  %2843 = vpow2.f32 %v2424_v17 }
 0x29f   :  { %v2826_v23 = vpop.eup %2825  ;;  %2845 = vpow2.f32 %v2439_v18 }
 0x2a0   :  { %v2828_v1 = vpop.eup %2827  ;;  %2847 = vpow2.f32 %v2441_v19 }
 0x2a1   :  { %v2830_v24 = vpop.eup %2829  ;;  %2849 = vpow2.f32 %v2443_v21  ;;  %v2388_v4 = vadd.f32 %v2828_v1, %v2822_v20 }
 0x2a2   :  { %v2832_v25 = vpop.eup %2831  ;;  %v2389_v5 = vadd.f32 %v2830_v24, %v2824_v22 }
 0x2a3   :  { %v2834_v26 = vpop.eup %2833  ;;  %v2390_v27 = vadd.f32 %v2832_v25, %v2826_v23 }
 0x2a4   :  { %v2836_v28 = vpop.eup %2835  ;;  %v2407_v29 = vadd.f32 %v2834_v26, %v2388_v4 }
 0x2a5   :  { %v2838_v30 = vpop.eup %2837  ;;  %v2408_v31 = vadd.f32 %v2836_v28, %v2389_v5 }
 0x2a6   :  { %v2840_v32 = vpop.eup %2839  ;;  %v2409_v33 = vadd.f32 %v2838_v30, %v2390_v27 }
 0x2a7   :  { %v2842_v34 = vpop.eup %2841  ;;  %v2426_v35 = vadd.f32 %v2840_v32, %v2407_v29 }
 0x2a8   :  { %v2844_v36 = vpop.eup %2843  ;;  %v2427_v37 = vadd.f32 %v2842_v34, %v2408_v31 }
 0x2a9   :  { %v2846_v38 = vpop.eup %2845  ;;  %v2428_v39 = vadd.f32 %v2844_v36, %v2409_v33 }
 0x2aa   :  { %v2848_v40 = vpop.eup %2847  ;;  %v2445_v41 = vadd.f32 %v2846_v38, %v2426_v35 }
 0x2ab   :  { %v2850_v42 = vpop.eup %2849  ;;  %v2446_v43 = vadd.f32 %v2848_v40, %v2427_v37 }
 0x2ac   :  { %v2448_v44 = vsel %vm2312_vm2, %v2445_v41, 0.0  ;;  %v2447_v45 = vadd.f32 %v2850_v42, %v2428_v39 }
 0x2ad   :  { %v2461_v46 = vsel %vm2312_vm2, %v2446_v43, 0.0  ;;  %2449 = vadd.xlane.f32.xlu1 %v2448_v44 }
 0x2ae   :  { %2462 = vadd.xlane.f32.xlu0 %v2461_v46  ;;  %v2474_v47 = vsel %vm2312_vm2, %v2447_v45, 0.0 }
 0x2b1   :  { %2475 = vadd.xlane.f32.xlu1 %v2474_v47 }
 0x33a   :  { %v2450_v48 = vpop.xlane.xlu1 %2449 }
 0x33b   :  { %v2463_v49 = vpop.xlane.xlu0 %2462  ;;  %v2451_v50 = vrot.slane %v2450_v48, 4 }
 0x33c   :  { %v2464_v51 = vrot.slane %v2463_v49, 4 }
 0x33d   :  { %v2452_v52 = vadd.f32 %v2451_v50, %v2450_v48 }
 0x33e   :  { %v2465_v53 = vadd.f32 %v2464_v51, %v2463_v49  ;;  %v2476_v54 = vpop.xlane.xlu1 %2475 }
 0x33f   :  { %v2453_v55 = vrot.slane %v2452_v52, 2  ;;  %v2477_v56 = vrot.slane %v2476_v54, 4 }
 0x340   :  { %v2466_v57 = vrot.slane %v2465_v53, 2 }
 0x341   :  { %v2478_v58 = vadd.f32 %v2477_v56, %v2476_v54  ;;  %v2454_v59 = vadd.f32 %v2453_v55, %v2452_v52 }
 0x342   :  { %v2467_v60 = vadd.f32 %v2466_v57, %v2465_v53 }
 0x343   :  { %v2479_v61 = vrot.slane %v2478_v58, 2  ;;  %v2455_v62 = vrot.slane %v2454_v59, 1 }
 0x344   :  { %v2468_v63 = vrot.slane %v2467_v60, 1 }
 0x345   :  { %v2480_v0 = vadd.f32 %v2479_v61, %v2478_v58  ;;  %v2456_v2 = vadd.f32 %v2455_v62, %v2454_v59 }
 0x346   :  { %v2469_v3 = vadd.f32 %v2468_v63, %v2467_v60 }
 0x347   :  { %2798 = vpush %v2456_v2  ;;  %v2481_v6 = vrot.slane %v2480_v0, 1 }
 0x348   :  { %2800 = vpush %v2469_v3 }
 0x349   :  { %v2482_v7 = vadd.f32 %v2481_v6, %v2480_v0 }
 0x34b   :  { %2802 = vpush %v2482_v7 }
 0x378   :  { %s2799_s28 = spop %2798 }
 0x379   :  { %s2460_s29 = smul.f32 0.015625, %s2799_s28  ;;  %s2801_s30 = spop %2800 }
 0x37a   :  { %s2473_s0 = smul.f32 0.015625, %s2801_s30 }
 0x37b   :  { %2495 = sst [smem:[#allocation7 + $0x2]] %s2460_s29 }
 0x37c   :  { %2499 = sst [smem:[#allocation7 + $0x4]] %s2473_s0  ;;  %s2803_s3 = spop %2802 }
 0x37d   :  { %2501 = sst [smem:[#allocation7 + $0x5]] %s2473_s0  ;;  %s2486_s1 = smul.f32 0.015625, %s2803_s3 }
 0x37f   :  { %s2487_s4 = sadd.f32 %s2486_s1, %s2460_s29 }
 0x380   :  { %2497 = sst [smem:[#allocation7 + $0x3]] %s2486_s1 }
 0x381   :  { %s2488_s5 = ssub.f32 %s2487_s4, %s2473_s0 }
 0x383   :  { %s2489_s6 = ssub.f32 %s2488_s5, %s2473_s0 }
 0x385   :  { %2491 = sst [smem:[#allocation7]] %s2489_s6 }
 0x386   :  { %2904 = shalt.err (!%p2901_p4)
}
 0x387   :  { %s2917_s14 = smov [#allocation7]  }
 0x388   :  { %2509 = dma.smem_to_hbm %s2917_s14, 16, %s3175_s2, [#allocation4]  }
 0x389   :  { %2909 = dma.done.wait [#allocation4], 16  }
 0x38a   :  { %2910 = vsyncadd [#allocation4], 4294967280 }
 0x38b   :  { %2513 = sfence }
 0x38c   :  { %2514 = vsyncpa [#allocation3], 1 }
 0x38d   :  { %2515 = vsyncpa [#allocation6], 1 }
 0x38e   :  { %2516 = vsyncpa [#allocation4], 1 }

</bundles_post_ra>
